<compile_context>
chip_gen: v7x
topology: tpu7x:2x2x1
jax: 0.10.0
libtpu: 0.0.40
codegen_flags: <defaults>
</compile_context>

<pallas_src>
import math

import jax
import jax.numpy as jnp
from jax.experimental import pallas as pl
from jax.experimental.pallas import tpu as pltpu

_LANES = 128
_ROW_ALIGN = 32          # legal sublane packing for f32 / bf16 / int8 / fp8
_BLOCK_ROWS_CAP = 4096   # 4096 * 128 * 4 B = 2 MiB per f32 input tile


def _round_up(a, b):
    return ((a + b - 1) // b) * b


def _partial_sums(v):
    """Per-lane (8,128) partial sums of x_cos and x_cos*(v<=0) for one tile."""
    vf = v.astype(jnp.float32)
    mask = vf <= 0.0                      # tanh preserves sign -> same as (t<=0)
    t = jnp.tanh(vf)                      # EUP
    s = jnp.sin(0.5 * math.pi * t)        # EUP
    x_cos = s * s                         # = 1 - cos(pi/2 t)^2 ; x_sin = 1 - x_cos
    neg = jnp.where(mask, x_cos, 0.0)
    r = x_cos.shape[0] // 8
    # (rows,128) -> (rows/8, 8, 128) matches vreg layout exactly; summing over
    # the leading axis is plain vreg-by-vreg VPU adds (no cross-lane movement).
    tot8 = jnp.sum(x_cos.reshape(r, 8, _LANES), axis=0)
    neg8 = jnp.sum(neg.reshape(r, 8, _LANES), axis=0)
    return tot8, neg8


def _sincos_partial_kernel(x_ref, y_ref, o_ref):
    xt, xn = _partial_sums(x_ref[...])
    yt, yn = _partial_sums(y_ref[...])
    o_ref[0, 0, :, :] = xt
    o_ref[0, 1, :, :] = xn
    o_ref[0, 2, :, :] = yt
    o_ref[0, 3, :, :] = yn


def _pad_to_rows(flat, padded_rows):
    n = flat.shape[0]
    pad = padded_rows * _LANES - n
    if pad:
        flat = jnp.pad(flat, (0, pad))        # no-op copy is skipped when pad == 0
    return flat.reshape(padded_rows, _LANES)


def squared_chord(x, y, batch_size, n_bin=3):
    """Pallas implementation of SquaredChord(batch_size, n_bin).forward(x, y)."""
    # n_bin only parameterizes the (unused-in-forward) bin centers of the
    # reference module; kept for interface fidelity.
    del n_bin
    # torch.squeeze followed by global reductions -> flattening is equivalent.
    xf = jnp.reshape(x, (-1,))
    yf = jnp.reshape(y, (-1,))
    nx, ny = int(xf.shape[0]), int(yf.shape[0])

    rows_needed = max(1, -(-max(nx, ny) // _LANES))
    n_blocks = -(-rows_needed // _BLOCK_ROWS_CAP)
    block_rows = _round_up(-(-rows_needed // n_blocks), _ROW_ALIGN)
    padded_rows = n_blocks * block_rows

    x2 = _pad_to_rows(xf, padded_rows)
    y2 = _pad_to_rows(yf, padded_rows)

    partials = pl.pallas_call(
        _sincos_partial_kernel,
        out_shape=jax.ShapeDtypeStruct((n_blocks, 4, 8, _LANES), jnp.float32),
        grid_spec=pltpu.PrefetchScalarGridSpec(
            num_scalar_prefetch=0,
            grid=(n_blocks,),
            in_specs=[
                pl.BlockSpec((block_rows, _LANES), lambda i: (i, 0)),
                pl.BlockSpec((block_rows, _LANES), lambda i: (i, 0)),
            ],
            out_specs=pl.BlockSpec((1, 4, 8, _LANES), lambda i: (i, 0, 0, 0)),
        ),
        compiler_params=pltpu.CompilerParams(
            dimension_semantics=("parallel",),
            vmem_limit_bytes=32 * 1024 * 1024,
        ),
    )(x2, y2)

    # Tiny JAX epilogue: (n_blocks,4,8,128) partials -> 4 scalars -> distance.
    s = jnp.sum(partials, axis=(0, 2, 3))      # [x_tot, x_neg, y_tot, y_neg]
    inv_bs = 1.0 / float(batch_size)
    zero = jnp.float32(0.0)
    # hist order matches the reference: [neg, mid, pos]; clamp at 0 so f32
    # rounding in the subtractions can never feed sqrt a tiny negative.
    x_hist = jnp.stack([s[1],
                        jnp.maximum(nx - s[0], zero),
                        jnp.maximum(s[0] - s[1], zero)]) * inv_bs
    y_hist = jnp.stack([s[3],
                        jnp.maximum(ny - s[2], zero),
                        jnp.maximum(s[2] - s[3], zero)]) * inv_bs
    d = jnp.sqrt(x_hist) - jnp.sqrt(y_hist)
    return jnp.sum(d * d, keepdims=True)       # shape (1,), matches torch.sum(c, dim=0)


def _reference(x, y, batch_size):
    def hist(v):
        t = jnp.tanh(jnp.reshape(v, (-1,)).astype(jnp.float32))
        x_cos = 1.0 - jnp.cos(0.5 * math.pi * t) ** 2
        x_sin = 1.0 - jnp.sin(0.5 * math.pi * t) ** 2
        return jnp.stack([
            jnp.sum(x_cos * (t <= 0.0)),
            jnp.sum(x_sin),
            jnp.sum(x_cos * (t > 0.0)),
        ])[:, None] / batch_size

    hx, hy = hist(x), hist(y)
    c = (jnp.sqrt(hx) - jnp.sqrt(hy)) ** 2
    return jnp.sum(c, axis=0)


if __name__ == "__main__":
    batch_size = 2
    n_bin = 3
    key = jax.random.PRNGKey(0)
    kx, ky = jax.random.split(key)
    # NCHW-style inputs as the torch module would receive.
    x = jax.random.normal(kx, (batch_size, 4, 16, 16), dtype=jnp.float32)
    y = jax.random.normal(ky, (batch_size, 4, 16, 16), dtype=jnp.float32)

    out = jax.block_until_ready(squared_chord(x, y, batch_size, n_bin))
    ref = jax.block_until_ready(_reference(x, y, batch_size))

    assert out.shape == (1,), out.shape
    assert jnp.allclose(out, ref, atol=1e-3, rtol=1e-3), (out, ref)

    print("KERNEL_OK")
</pallas_src>

<mosaic_0001>
module attributes {stable_mosaic.version = 11 : i64} {
  func.func @_sincos_partial_kernel(%arg0: i32, %arg1: memref<32x128xf32, #tpu.memory_space<vmem>>, %arg2: memref<32x128xf32, #tpu.memory_space<vmem>>, %arg3: memref<1x4x8x128xf32, #tpu.memory_space<vmem>>) attributes {dimension_semantics = [#tpu.dimension_semantics<parallel>], iteration_bounds = array<i64: 1>, scalar_prefetch = 0 : i64, scratch_operands = 0 : i64, tpu.core_type = #tpu.core_type<tc>, window_params = [{transform_indices = @transform_0, window_bounds = array<i64: 32, 128>}, {transform_indices = @transform_1, window_bounds = array<i64: 32, 128>}, {transform_indices = @transform_2, window_bounds = array<i64: 1, 4, 8, 128>}]} {
    %c0 = arith.constant 0 : index
    %c0_0 = arith.constant 0 : index
    %0 = vector.load %arg1[%c0, %c0_0] : memref<32x128xf32, #tpu.memory_space<vmem>>, vector<32x128xf32>
    %cst = arith.constant 0.000000e+00 : f32
    %1 = vector.broadcast %cst : f32 to vector<32x128xf32>
    %2 = arith.cmpf ole, %0, %1 : vector<32x128xf32>
    %3 = math.tanh %0 : vector<32x128xf32>
    %cst_1 = arith.constant 1.57079637 : f32
    %4 = vector.broadcast %cst_1 : f32 to vector<32x128xf32>
    %5 = arith.mulf %4, %3 : vector<32x128xf32>
    %6 = math.sin %5 : vector<32x128xf32>
    %7 = arith.mulf %6, %6 : vector<32x128xf32>
    %cst_2 = arith.constant 0.000000e+00 : f32
    %8 = vector.broadcast %cst_2 : f32 to vector<32x128xf32>
    %9 = arith.select %2, %7, %8 : vector<32x128xi1>, vector<32x128xf32>
    %10 = vector.shape_cast %7 : vector<32x128xf32> to vector<4x8x128xf32>
    %cst_3 = arith.constant dense<0.000000e+00> : vector<8x128xf32>
    %11 = vector.multi_reduction <add>, %10, %cst_3 [0] : vector<4x8x128xf32> to vector<8x128xf32>
    %12 = vector.shape_cast %9 : vector<32x128xf32> to vector<4x8x128xf32>
    %cst_4 = arith.constant dense<0.000000e+00> : vector<8x128xf32>
    %13 = vector.multi_reduction <add>, %12, %cst_4 [0] : vector<4x8x128xf32> to vector<8x128xf32>
    %c0_5 = arith.constant 0 : index
    %c0_6 = arith.constant 0 : index
    %14 = vector.load %arg2[%c0_5, %c0_6] : memref<32x128xf32, #tpu.memory_space<vmem>>, vector<32x128xf32>
    %cst_7 = arith.constant 0.000000e+00 : f32
    %15 = vector.broadcast %cst_7 : f32 to vector<32x128xf32>
    %16 = arith.cmpf ole, %14, %15 : vector<32x128xf32>
    %17 = math.tanh %14 : vector<32x128xf32>
    %cst_8 = arith.constant 1.57079637 : f32
    %18 = vector.broadcast %cst_8 : f32 to vector<32x128xf32>
    %19 = arith.mulf %18, %17 : vector<32x128xf32>
    %20 = math.sin %19 : vector<32x128xf32>
    %21 = arith.mulf %20, %20 : vector<32x128xf32>
    %cst_9 = arith.constant 0.000000e+00 : f32
    %22 = vector.broadcast %cst_9 : f32 to vector<32x128xf32>
    %23 = arith.select %16, %21, %22 : vector<32x128xi1>, vector<32x128xf32>
    %24 = vector.shape_cast %21 : vector<32x128xf32> to vector<4x8x128xf32>
    %cst_10 = arith.constant dense<0.000000e+00> : vector<8x128xf32>
    %25 = vector.multi_reduction <add>, %24, %cst_10 [0] : vector<4x8x128xf32> to vector<8x128xf32>
    %26 = vector.shape_cast %23 : vector<32x128xf32> to vector<4x8x128xf32>
    %cst_11 = arith.constant dense<0.000000e+00> : vector<8x128xf32>
    %27 = vector.multi_reduction <add>, %26, %cst_11 [0] : vector<4x8x128xf32> to vector<8x128xf32>
    %c0_12 = arith.constant 0 : index
    %c0_13 = arith.constant 0 : index
    %c0_14 = arith.constant 0 : index
    %c0_15 = arith.constant 0 : index
    %28 = vector.load %arg3[%c0_12, %c0_13, %c0_14, %c0_15] : memref<1x4x8x128xf32, #tpu.memory_space<vmem>>, vector<1x1x8x128xf32>
    %29 = vector.shape_cast %28 : vector<1x1x8x128xf32> to vector<8x128xf32>
    %30 = vector.shape_cast %11 : vector<8x128xf32> to vector<1x1x8x128xf32>
    tpu.vector_store %arg3[%c0_12, %c0_13, %c0_14, %c0_15], %30 {strides = array<i32>} : memref<1x4x8x128xf32, #tpu.memory_space<vmem>>, vector<1x1x8x128xf32>,
    %c0_16 = arith.constant 0 : index
    %c1 = arith.constant 1 : index
    %c0_17 = arith.constant 0 : index
    %c0_18 = arith.constant 0 : index
    %31 = vector.load %arg3[%c0_16, %c1, %c0_17, %c0_18] : memref<1x4x8x128xf32, #tpu.memory_space<vmem>>, vector<1x1x8x128xf32>
    %32 = vector.shape_cast %31 : vector<1x1x8x128xf32> to vector<8x128xf32>
    %33 = vector.shape_cast %13 : vector<8x128xf32> to vector<1x1x8x128xf32>
    tpu.vector_store %arg3[%c0_16, %c1, %c0_17, %c0_18], %33 {strides = array<i32>} : memref<1x4x8x128xf32, #tpu.memory_space<vmem>>, vector<1x1x8x128xf32>,
    %c0_19 = arith.constant 0 : index
    %c2 = arith.constant 2 : index
    %c0_20 = arith.constant 0 : index
    %c0_21 = arith.constant 0 : index
    %34 = vector.load %arg3[%c0_19, %c2, %c0_20, %c0_21] : memref<1x4x8x128xf32, #tpu.memory_space<vmem>>, vector<1x1x8x128xf32>
    %35 = vector.shape_cast %34 : vector<1x1x8x128xf32> to vector<8x128xf32>
    %36 = vector.shape_cast %25 : vector<8x128xf32> to vector<1x1x8x128xf32>
    tpu.vector_store %arg3[%c0_19, %c2, %c0_20, %c0_21], %36 {strides = array<i32>} : memref<1x4x8x128xf32, #tpu.memory_space<vmem>>, vector<1x1x8x128xf32>,
    %c0_22 = arith.constant 0 : index
    %c3 = arith.constant 3 : index
    %c0_23 = arith.constant 0 : index
    %c0_24 = arith.constant 0 : index
    %37 = vector.load %arg3[%c0_22, %c3, %c0_23, %c0_24] : memref<1x4x8x128xf32, #tpu.memory_space<vmem>>, vector<1x1x8x128xf32>
    %38 = vector.shape_cast %37 : vector<1x1x8x128xf32> to vector<8x128xf32>
    %39 = vector.shape_cast %27 : vector<8x128xf32> to vector<1x1x8x128xf32>
    tpu.vector_store %arg3[%c0_22, %c3, %c0_23, %c0_24], %39 {strides = array<i32>} : memref<1x4x8x128xf32, #tpu.memory_space<vmem>>, vector<1x1x8x128xf32>,
    return
  }
  func.func @transform_0(%arg0: i32) -> (i32, i32) {
    %c0_i32 = arith.constant 0 : i32
    %c0_i32_0 = arith.constant 0 : i32
    return %arg0, %c0_i32 : i32, i32
  }
  func.func @transform_1(%arg0: i32) -> (i32, i32) {
    %c0_i32 = arith.constant 0 : i32
    %c0_i32_0 = arith.constant 0 : i32
    return %arg0, %c0_i32 : i32, i32
  }
  func.func @transform_2(%arg0: i32) -> (i32, i32, i32, i32) {
    %c0_i32 = arith.constant 0 : i32
    %c0_i32_0 = arith.constant 0 : i32
    %c0_i32_1 = arith.constant 0 : i32
    %c0_i32_2 = arith.constant 0 : i32
    return %arg0, %c0_i32, %c0_i32_0, %c0_i32_1 : i32, i32, i32, i32
  }
}

</mosaic_0001>

<bundles_post_ra>
// kernel: tpu_custom_call.1
= control target key start
LH: loop header
LB: loop body
LE: loop exit
PB: predicated region body
PF: predicated region fallthrough
CT: control target
= control target key end

     0   :  { %7 = vsyncpa [#allocation3], 0  ;;  %s1941_s0 = inlined_call_operand.hbm [shape: f32[32,128], index: 0, kind: input, shape index: {}]   ;;  %s1942_s1 = inlined_call_operand.hbm [shape: f32[32,128], index: 1, kind: input, shape index: {}]   ;;  %s1943_s2 = inlined_call_operand.hbm [shape: f32[1,4,8,128], index: 2, kind: output, shape index: {}]  }
   0x1   :  { %8 = vsyncpa [#allocation6], 0 }
   0x2   :  { %9 = vsyncpa [#allocation4], 0  ;;  %s1155_s9 = smov [#allocation2]   ;;  %s1083_s13 = scalar_lea.hbm %s1941_s0, 512 }
   0x3   :  { %s15_s10 = sshll.u32 %s1155_s9, 4  ;;  %p1084_p0 = scmp.ne.s32.totalorder %s1941_s0, %s1083_s13  ;;  %s16_s10 = int_to_ptr.vmem [resolvable:$true] %s15_s10 }
   0x4   :  { %p1087_p1 = scmp.lt.u32.totalorder %s1083_s13, %s1941_s0 }
   0x6   :  { %p1089_p2 = pnand %p1087_p1, %p1084_p0 }
   0x8   :  { %1092 = shalt.err (!%p1089_p2)
}
   0x9   :  { %s1093_s18 = scalar_lea.vmem %s16_s10, 512  ;;  %p1098_p4 = scmp.lt.s32.totalorder %s16_s10, %s16_s10 }
   0xa   :  { %p1094_p3 = scmp.ne.s32.totalorder %s16_s10, %s1093_s18  ;;  %p1099_p5 = scmp.lt.s32.totalorder %s1093_s18, %s1093_s18 }
   0xc   :  { %p1100_p6 = por %p1099_p5, %p1098_p4 }
   0xe   :  { %p1101_p7 = pnand %p1100_p6, %p1094_p3 }
  0x10   :  { %1104 = shalt.err (!%p1101_p7)
}
  0x11   :  { %s1156_s19 = smov 128   ;;  %s1157_s20 = smov 8  }
  0x12   :  { %21 = dma.hbm_to_vmem [thread:$0]  %s1941_s0, 512, %s16_s10, [#allocation3], %s1156_s19, %s1156_s19, %s1157_s20  }
  0x13   :  { %s1158_s23 = smov [#allocation5]   ;;  %s1105_s27 = scalar_lea.hbm %s1942_s1, 512 }
  0x14   :  { %s27_s24 = sshll.u32 %s1158_s23, 4  ;;  %p1106_p8 = scmp.ne.s32.totalorder %s1942_s1, %s1105_s27  ;;  %s28_s24 = int_to_ptr.vmem [resolvable:$true] %s27_s24 }
  0x15   :  { %p1109_p9 = scmp.lt.u32.totalorder %s1105_s27, %s1942_s1 }
  0x17   :  { %p1111_p10 = pnand %p1109_p9, %p1106_p8 }
  0x19   :  { %1114 = shalt.err (!%p1111_p10)
}
  0x1a   :  { %s1115_s4 = scalar_lea.vmem %s28_s24, 512  ;;  %p1120_p12 = scmp.lt.s32.totalorder %s28_s24, %s28_s24 }
  0x1b   :  { %p1116_p11 = scmp.ne.s32.totalorder %s28_s24, %s1115_s4  ;;  %p1121_p13 = scmp.lt.s32.totalorder %s1115_s4, %s1115_s4 }
  0x1d   :  { %p1122_p0 = por %p1121_p13, %p1120_p12 }
  0x1f   :  { %p1123_p1 = pnand %p1122_p0, %p1116_p11 }
  0x21   :  { %1126 = shalt.err (!%p1123_p1)
}
  0x22   :  { %33 = dma.hbm_to_vmem [thread:$0]  %s1942_s1, 512, %s28_s24, [#allocation6], %s1156_s19, %s1156_s19, %s1157_s20  }
  0x23   :  { %1149 = dma.done.wait [#allocation3], 512  }
  0x24   :  { %1150 = vsyncadd [#allocation3], 4294966784 }
  0x25   :  { %1151 = dma.done.wait [#allocation6], 512  }
  0x26   :  { %1152 = vsyncadd [#allocation6], 4294966784  ;;  %v1211_v0 = vld [vmem:[#allocation2] sm:$0xff]  ;;  %v1213_v1 = vld [vmem:[#allocation2 + $0x8] sm:$0xff]  ;;  %v1159_v35 = vmov 683565275  }
  0x27   :  { %v1215_v2 = vld [vmem:[#allocation2 + $0x10] sm:$0xff]  ;;  %1032 = vtanh.f32 %v1211_v0  ;;  %v43_v21 = vld [vmem:[#allocation2 + $0x18] sm:$0xff]  ;;  %v1160_v37 = vmov 2475754826   ;;  %v1161_v39 = vmov 2131351028  }
  0x28   :  { %1034 = vtanh.f32 %v1213_v1  ;;  %v1162_v41 = vmov 2102212464   ;;  %v1163_v43 = vmov 920167782   ;;  %v1164_v51 = vmov 1326507024  }
  0x29   :  { %1036 = vtanh.f32 %v1215_v2  ;;  %s1165_s1 = smov [#allocation7]  }
  0x2a   :  { %1038 = vtanh.f32 %v43_v21  ;;  %s944_s6 = sshll.u32 %s1165_s1, 4  ;;  %s945_s6 = int_to_ptr.vmem [resolvable:$true] %s944_s6 }
  0x2b   :  { %s1127_s7 = scalar_lea.vmem %s945_s6, 512  ;;  %p1132_p3 = scmp.lt.s32.totalorder %s945_s6, %s945_s6 }
  0x2c   :  { %p1128_p2 = scmp.ne.s32.totalorder %s945_s6, %s1127_s7  ;;  %p1133_p4 = scmp.lt.s32.totalorder %s1127_s7, %s1127_s7 }
  0x2e   :  { %p1134_p5 = por %p1133_p4, %p1132_p3 }
  0x30   :  { %p1135_p6 = pnand %p1134_p5, %p1128_p2 }
  0x31   :  { %v1033_v3 = vpop.eup %1032 }
  0x32   :  { %v1035_v4 = vpop.eup %1034  ;;  %v1220_v5 = vmul.f32 1.5707964, %v1033_v3 }
  0x33   :  { %v1037_v6 = vpop.eup %1036  ;;  %v1222_v7 = vmul.f32 1.5707964, %v1035_v4 }
  0x34   :  { %v56_v8 = vand.u32 2147483647, %v1220_v5  ;;  %v59_v9 = vand.u32 2139095040, %v1220_v5  ;;  %v1226_v10 = vmul.f32 1.5707964, %v1037_v6  ;;  %vm58_vm13 = vcmp.lt.s32.totalorder %v1220_v5, 0 }
  0x35   :  { %v160_v11 = vand.u32 2147483647, %v1222_v7  ;;  %v163_v13 = vand.u32 2139095040, %v1222_v7 }
  0x36   :  { %v60_v12 = vshrl.u32 %v59_v9, 23  ;;  %v63_v14 = vand.u32 8388607, %v56_v8  ;;  %v267_v18 = vand.u32 2139095040, %v1226_v10  ;;  %v264_v33 = vand.u32 2147483647, %v1226_v10 }
  0x37   :  { %v167_v15 = vand.u32 8388607, %v160_v11  ;;  %v164_v17 = vshrl.u32 %v163_v13, 23  ;;  %vm1346_vm15 = vcmp.le.f32.partialorder %v56_v8, 0.7853982 }
  0x38   :  { %v957_v16 = vadd.s32 4294967169, %v60_v12  ;;  %v64_v22 = vor.u32 8388608, %v63_v14  ;;  %v268_v24 = vshrl.u32 %v267_v18, 23  ;;  %v1039_v12 = vpop.eup %1038 }
  0x39   :  { %v961_v20 = vadd.s32 4294967169, %v164_v17  ;;  %v168_v23 = vor.u32 8388608, %v167_v15 }
  0x3a   :  { %v66_v19 = vadd.s32 1, %v957_v16  ;;  %v965_v27 = vadd.s32 4294967169, %v268_v24  ;;  %v1235_v30 = vshll.u32 %v64_v22, 8 }
  0x3b   :  { %v170_v25 = vadd.s32 1, %v961_v20  ;;  %v1237_v32 = vshll.u32 %v168_v23, 8 }
  0x3c   :  { %vm67_vm0 = vcmp.gt.s32.totalorder %v66_v19, 0  ;;  %v1245_v45 = vadd.s32 1, %v965_v27 }
  0x3d   :  { %v68_v26 = vsel %vm67_vm0, %v66_v19, 0  ;;  %vm171_vm1 = vcmp.gt.s32.totalorder %v170_v25, 0 }
  0x3e   :  { %v69_v28 = vshrl.u32 %v68_v26, 5  ;;  %v70_v29 = vand.u32 31, %v68_v26  ;;  %v172_v31 = vsel %vm171_vm1, %v170_v25, 0  ;;  %vm275_vm8 = vcmp.gt.s32.totalorder %v1245_v45, 0 }
  0x3f   :  { %v173_v58 = vshrl.u32 %v172_v31, 5  ;;  %v174_v59 = vand.u32 31, %v172_v31 }
  0x40   :  { %v71_v34 = vsub.s32 32, %v70_v29  ;;  %v73_v36 = vshll.u32 %v1159_v35, %v70_v29  ;;  %v76_v38 = vshll.u32 %v1160_v37, %v70_v29  ;;  %v79_v40 = vshll.u32 %v1161_v39, %v70_v29 }
  0x41   :  { %v82_v42 = vshll.u32 %v1162_v41, %v70_v29  ;;  %v85_v44 = vshll.u32 %v1163_v43, %v70_v29  ;;  %vm88_vm2 = vcmp.lt.s32.totalorder %v69_v28, 1  ;;  %vm89_vm3 = vcmp.lt.s32.totalorder %v69_v28, 2 }
  0x42   :  { %v72_v46 = vshrl.u32 %v1159_v35, %v71_v34  ;;  %v74_v47 = vshrl.u32 %v1160_v37, %v71_v34  ;;  %v77_v48 = vshrl.u32 %v1161_v39, %v71_v34  ;;  %v80_v49 = vshrl.u32 %v1162_v41, %v71_v34 }
  0x43   :  { %v83_v50 = vshrl.u32 %v1163_v43, %v71_v34  ;;  %v86_v52 = vshrl.u32 %v1164_v51, %v71_v34  ;;  %vm90_vm4 = vcmp.lt.s32.totalorder %v69_v28, 3  ;;  %vm91_vm5 = vcmp.lt.s32.totalorder %v69_v28, 4 }
  0x44   :  { %v75_v53 = vor.u32 %v74_v47, %v73_v36  ;;  %v78_v54 = vor.u32 %v77_v48, %v76_v38  ;;  %v81_v55 = vor.u32 %v80_v49, %v79_v40  ;;  %v175_v9 = vsub.s32 32, %v174_v59 }
  0x45   :  { %v84_v56 = vor.u32 %v83_v50, %v82_v42  ;;  %v87_v57 = vor.u32 %v86_v52, %v85_v44  ;;  %v177_v16 = vshll.u32 %v1159_v35, %v174_v59  ;;  %v180_v26 = vshll.u32 %v1160_v37, %v174_v59 }
  0x46   :  { %v92_v60 = vsel %vm88_vm2, %v72_v46, %v75_v53  ;;  %v93_v61 = vsel %vm91_vm5, %v81_v55, 2102212464  ;;  %v96_v62 = vsel %vm88_vm2, %v75_v53, %v78_v54  ;;  %v100_v63 = vsel %vm88_vm2, %v78_v54, %v81_v55 }
  0x47   :  { %v94_v3 = vsel %vm90_vm4, %v78_v54, %v93_v61  ;;  %v97_v4 = vsel %vm91_vm5, %v84_v56, 920167782  ;;  %v101_v6 = vsel %vm91_vm5, %v87_v57, 1326507024  ;;  %v176_v20 = vshrl.u32 %v1159_v35, %v175_v9 }
  0x48   :  { %v95_v13 = vsel %vm89_vm3, %v92_v60, %v94_v3  ;;  %v98_v14 = vsel %vm90_vm4, %v81_v55, %v97_v4  ;;  %v102_v15 = vsel %vm90_vm4, %v84_v56, %v101_v6  ;;  %v178_v25 = vshrl.u32 %v1160_v37, %v175_v9 }
  0x49   :  { %v99_v17 = vsel %vm89_vm3, %v96_v62, %v98_v14  ;;  %v103_v18 = vsel %vm89_vm3, %v100_v63, %v102_v15  ;;  %v111_v19 = vmul.u32 %v1235_v30, %v95_v13  ;;  %v181_v27 = vshrl.u32 %v1161_v39, %v175_v9 }
  0x4a   :  { %v1266_v21 = vmul.u32.u64.low %v1235_v30, %v103_v18  ;;  %v1267_v22 = vmul.u32.u64.high %v1235_v30, %v103_v18, %v1266_v21  ;;  %v1270_v23 = vmul.u32.u64.low %v1235_v30, %v99_v17  ;;  %v1271_v24 = vmul.u32.u64.high %v1235_v30, %v99_v17, %v1270_v23  ;;  %v486_v17 = vld [vmem:[#allocation5] sm:$0xff] }
  0x4b   :  { %v183_v28 = vshll.u32 %v1161_v39, %v174_v59  ;;  %v184_v29 = vshrl.u32 %v1162_v41, %v175_v9  ;;  %v186_v31 = vshll.u32 %v1162_v41, %v174_v59  ;;  %v187_v34 = vshrl.u32 %v1163_v43, %v175_v9 }
  0x4c   :  { %v189_v36 = vshll.u32 %v1163_v43, %v174_v59  ;;  %v179_v38 = vor.u32 %v178_v25, %v177_v16  ;;  %v182_v30 = vor.u32 %v181_v27, %v180_v26  ;;  %v190_v40 = vshrl.u32 %v1164_v51, %v175_v9 }
  0x4d   :  { %vm192_vm6 = vcmp.lt.s32.totalorder %v173_v58, 1  ;;  %vm113_vm7 = vc.u32 %v1267_v22, %v1270_v23  ;;  %v114_v42 = vadd.s32 1, %v1271_v24  ;;  %v185_v44 = vor.u32 %v184_v29, %v183_v28 }
  0x4e   :  { %v188_v46 = vor.u32 %v187_v34, %v186_v31  ;;  %v191_v47 = vor.u32 %v190_v40, %v189_v36  ;;  %vm193_vm9 = vcmp.lt.s32.totalorder %v173_v58, 2  ;;  %vm194_vm10 = vcmp.lt.s32.totalorder %v173_v58, 3 }
  0x4f   :  { %v115_v48 = vsel %vm113_vm7, %v114_v42, %v1271_v24  ;;  %vm195_vm11 = vcmp.lt.s32.totalorder %v173_v58, 4  ;;  %v196_v49 = vsel %vm192_vm6, %v176_v20, %v179_v38  ;;  %v200_v50 = vsel %vm192_vm6, %v179_v38, %v182_v30  ;;  %v487_v58 = vld [vmem:[#allocation5 + $0x8] sm:$0xff] }
  0x50   :  { %v116_v52 = vadd.s32 %v115_v48, %v111_v19  ;;  %v197_v53 = vsel %vm195_vm11, %v185_v44, 2102212464  ;;  %v201_v54 = vsel %vm195_vm11, %v188_v46, 920167782  ;;  %v204_v55 = vsel %vm192_vm6, %v182_v30, %v185_v44 }
  0x51   :  { %v198_v56 = vsel %vm194_vm10, %v182_v30, %v197_v53  ;;  %v202_v57 = vsel %vm194_vm10, %v185_v44, %v201_v54  ;;  %v205_v59 = vsel %vm195_vm11, %v191_v47, 1326507024  ;;  %v276_v63 = vsel %vm275_vm8, %v1245_v45, 0 }
  0x52   :  { %v117_v60 = vadd.s32 536870912, %v116_v52  ;;  %v203_v61 = vsel %vm193_vm9, %v200_v50, %v202_v57  ;;  %v206_v62 = vsel %vm194_vm10, %v188_v46, %v205_v59  ;;  %v199_v3 = vsel %vm193_vm9, %v196_v49, %v198_v56 }
  0x53   :  { %v207_v4 = vsel %vm193_vm9, %v204_v55, %v206_v62  ;;  %v1298_v6 = vmul.u32.u64.low %v1237_v32, %v203_v61  ;;  %v1299_v9 = vmul.u32.u64.high %v1237_v32, %v203_v61, %v1298_v6  ;;  %v271_v16 = vand.u32 8388607, %v264_v33 }
  0x54   :  { %v1302_v13 = vshrl.u32 %v117_v60, 30  ;;  %v1305_v14 = vmul.u32.u64.low %v1237_v32, %v207_v4  ;;  %v1306_v15 = vmul.u32.u64.high %v1237_v32, %v207_v4, %v1305_v14  ;;  %v1310_v45 = vmul.f32 1.5707964, %v1039_v12 }
  0x55   :  { %v278_v18 = vand.u32 31, %v276_v63  ;;  %v215_v20 = vmul.u32 %v1237_v32, %v199_v3  ;;  %v218_v21 = vadd.s32 1, %v1299_v9  ;;  %1040 = vtanh.f32 %v486_v17 }
  0x56   :  { %v119_v19 = vshll.u32 %v1302_v13, 30  ;;  %vm217_vm12 = vc.u32 %v1306_v15, %v1298_v6  ;;  %v272_v26 = vor.u32 8388608, %v271_v16  ;;  %1042 = vtanh.f32 %v487_v58 }
  0x57   :  { %v279_v24 = vsub.s32 32, %v278_v18  ;;  %v219_v12 = vsel %vm217_vm12, %v218_v21, %v1299_v9  ;;  %v281_v27 = vshll.u32 %v1159_v35, %v278_v18  ;;  %v284_v28 = vshll.u32 %v1160_v37, %v278_v18 }
  0x58   :  { %v1315_v25 = vsub.s32 %v116_v52, %v119_v19  ;;  %v371_v29 = vand.u32 2139095040, %v1310_v45  ;;  %v220_v31 = vadd.s32 %v219_v12, %v215_v20  ;;  %v1326_v38 = vshrl.u32 %v276_v63, 5 }
  0x59   :  { %v282_v34 = vshrl.u32 %v1160_v37, %v279_v24  ;;  %v285_v36 = vshrl.u32 %v1161_v39, %v279_v24  ;;  %v287_v30 = vshll.u32 %v1161_v39, %v278_v18  ;;  %v288_v40 = vshrl.u32 %v1162_v41, %v279_v24 }
  0x5a   :  { %v122_v32 = vsub.s32 0, %v1315_v25  ;;  %v290_v42 = vshll.u32 %v1162_v41, %v278_v18  ;;  %v221_v46 = vadd.s32 536870912, %v220_v31  ;;  %v1333_v47 = vshll.u32 %v272_v26, 8 }
  0x5b   :  { %v368_v48 = vand.u32 2147483647, %v1310_v45  ;;  %v291_v49 = vshrl.u32 %v1163_v43, %v279_v24  ;;  %v293_v50 = vshll.u32 %v1163_v43, %v278_v18  ;;  %v294_v52 = vshrl.u32 %v1164_v51, %v279_v24 }
  0x5c   :  { %v958_v44 = vmin.u32 %v122_v32, %v1315_v25  ;;  %v372_v53 = vshrl.u32 %v371_v29, 23  ;;  %v112_v54 = vadd.s32 %v1270_v23, %v1267_v22  ;;  %v283_v56 = vor.u32 %v282_v34, %v281_v27 }
  0x5d   :  { %v286_v57 = vor.u32 %v285_v36, %v284_v28  ;;  %v1341_v59 = vshrl.u32 %v221_v46, 30  ;;  %v289_v60 = vor.u32 %v288_v40, %v287_v30  ;;  %v292_v61 = vor.u32 %v291_v49, %v290_v42 }
  0x5e   :  { %v124_v55 = vclz %v958_v44  ;;  %vm296_vm14 = vcmp.lt.s32.totalorder %v1326_v38, 1  ;;  %v142_v3 = vsub.s32 4, %v1302_v13  ;;  %vm298_vm0 = vcmp.lt.s32.totalorder %v1326_v38, 3 }
  0x5f   :  { %vm299_vm1 = vcmp.lt.s32.totalorder %v1326_v38, 4  ;;  %v1353_v22 = vpop.eup %1040  ;;  %v223_v23 = vshll.u32 %v1341_v59, 30  ;;  %v280_v4 = vshrl.u32 %v1159_v35, %v279_v24  ;;  %v295_v9 = vor.u32 %v294_v52, %v293_v50 }
  0x60   :  { %v959_v63 = vadd.s32 4294967294, %v124_v55  ;;  %v305_v8 = vsel %vm299_vm1, %v292_v61, 920167782  ;;  %v1359_v14 = vpop.eup %1042  ;;  %vm297_vm3 = vcmp.lt.s32.totalorder %v1326_v38, 2  ;;  %v304_v16 = vsel %vm296_vm14, %v283_v56, %v286_v57 }
  0x61   :  { %v969_v17 = vadd.s32 4294967169, %v372_v53  ;;  %v1364_v58 = vsub.s32 %v220_v31, %v223_v23  ;;  %v301_v19 = vsel %vm299_vm1, %v289_v60, 2102212464  ;;  %v306_v20 = vsel %vm298_vm0, %v289_v60, %v305_v8 }
  0x62   :  { %vm960_vm2 = vcmp.lt.s32.totalorder %v959_v63, 0  ;;  %v308_v12 = vsel %vm296_vm14, %v286_v57, %v289_v60  ;;  %v143_v27 = vsel %vm58_vm13, %v142_v3, %v1302_v13  ;;  %vm162_vm4 = vcmp.lt.s32.totalorder %v1222_v7, 0 }
  0x63   :  { %v127_v18 = vsel %vm960_vm2, 0, %v959_v63  ;;  %v226_v28 = vsub.s32 0, %v1364_v58  ;;  %v300_v29 = vsel %vm296_vm14, %v280_v4, %v283_v56  ;;  %v309_v32 = vsel %vm299_vm1, %v295_v9, 1326507024 }
  0x64   :  { %v128_v21 = vsub.s32 32, %v127_v18  ;;  %v129_v24 = vshll.u32 %v1315_v25, %v127_v18  ;;  %v132_v26 = vsub.s32 4294967266, %v127_v18  ;;  %v302_v34 = vsel %vm298_vm0, %v286_v57, %v301_v19 }
  0x65   :  { %v310_v36 = vsel %vm298_vm0, %v292_v61, %v309_v32  ;;  %v962_v13 = vmin.u32 %v226_v28, %v1364_v58  ;;  %v307_v30 = vsel %vm297_vm3, %v304_v16, %v306_v20  ;;  %v378_v42 = vadd.s32 1, %v969_v17 }
  0x66   :  { %v130_v31 = vshrl.u32 %v112_v54, %v128_v21  ;;  %v133_v25 = vadd.s32 127, %v132_v26  ;;  %v311_v40 = vsel %vm297_vm3, %v308_v12, %v310_v36  ;;  %v145_v52 = vsel %vm1346_vm15, 0, %v143_v27 }
  0x67   :  { %v1392_v49 = vmul.u32.u64.low %v1333_v47, %v311_v40  ;;  %v1393_v50 = vmul.u32.u64.high %v1333_v47, %v311_v40, %v1392_v49  ;;  %v228_v53 = vclz %v962_v13  ;;  %v246_v54 = vsub.s32 4, %v1341_v59 }
  0x68   :  { %v131_v44 = vor.u32 %v130_v31, %v129_v24  ;;  %v134_v46 = vshll.u32 %v133_v25, 23  ;;  %v303_v55 = vsel %vm297_vm3, %v300_v29, %v302_v34  ;;  %vm1407_vm5 = vcmp.le.f32.partialorder %v160_v11, 0.7853982 }
  0x69   :  { %v1401_v60 = vmul.u32.u64.low %v1333_v47, %v307_v30  ;;  %v1402_v61 = vmul.u32.u64.high %v1333_v47, %v307_v30, %v1401_v60  ;;  %v963_v3 = vadd.s32 4294967294, %v228_v53  ;;  %v1413_v23 = vand.u32 8388607, %v368_v48 }
  0x6a   :  { %v135_v56 = vor.u32 4788187, %v134_v46  ;;  %v138_v57 = vcvt.s32.f32 %v131_v44  ;;  %vm379_vm6 = vcmp.gt.s32.totalorder %v378_v42, 0  ;;  %v149_v4 = vadd.s32 3, %v145_v52 }
  0x6b   :  { %v216_v9 = vadd.s32 %v1298_v6, %v1306_v15  ;;  %v380_v8 = vsel %vm379_vm6, %v378_v42, 0  ;;  %vm964_vm7 = vcmp.lt.s32.totalorder %v963_v3, 0  ;;  %v319_v16 = vmul.u32 %v1333_v47, %v303_v55 }
  0x6c   :  { %v136_v38 = vand.u32 2147483647, %v135_v56  ;;  %vm321_vm8 = vc.u32 %v1393_v50, %v1401_v60  ;;  %v382_v11 = vand.u32 31, %v380_v8  ;;  %v231_v18 = vsel %vm964_vm7, 0, %v963_v3 }
  0x6d   :  { %v247_v19 = vsel %vm162_vm4, %v246_v54, %v1341_v59  ;;  %v322_v20 = vadd.s32 1, %v1402_v61  ;;  %v232_v21 = vsub.s32 32, %v231_v18  ;;  %v233_v24 = vshll.u32 %v1364_v58, %v231_v18 }
  0x6e   :  { %v139_v17 = vmul.f32 %v138_v57, %v136_v38  ;;  %v236_v6 = vsub.s32 4294967266, %v231_v18  ;;  %v376_v15 = vor.u32 8388608, %v1413_v23  ;;  %v1426_v47 = vand.u32 3, %v149_v4 }
  0x6f   :  { %v323_v12 = vsel %vm321_vm8, %v322_v20, %v1402_v61  ;;  %v383_v27 = vsub.s32 32, %v382_v11  ;;  %v234_v28 = vshrl.u32 %v216_v9, %v232_v21  ;;  %v249_v32 = vsel %vm1407_vm5, 0, %v247_v19 }
  0x70   :  { %v140_v26 = vxor.u32 2147483648, %v139_v17  ;;  %v237_v29 = vadd.s32 127, %v236_v6  ;;  %v324_v59 = vadd.s32 %v323_v12, %v319_v16  ;;  %v1433_v25 = vshrl.u32 %v380_v8, 5 }
  0x71   :  { %v385_v58 = vshll.u32 %v1159_v35, %v382_v11  ;;  %v388_v34 = vshll.u32 %v1160_v37, %v382_v11  ;;  %v235_v13 = vor.u32 %v234_v28, %v233_v24  ;;  %v386_v42 = vshrl.u32 %v1160_v37, %v383_v27 }
  0x72   :  { %v141_v31 = vsel %vm58_vm13, %v140_v26, %v139_v17  ;;  %v238_v30 = vshll.u32 %v237_v29, 23  ;;  %v325_v40 = vadd.s32 536870912, %v324_v59  ;;  %v389_v44 = vshrl.u32 %v1161_v39, %v383_v27 }
  0x73   :  { %v144_v36 = vsel %vm1346_vm15, %v1220_v5, %v141_v31  ;;  %v391_v46 = vshll.u32 %v1161_v39, %v382_v11  ;;  %v242_v52 = vcvt.s32.f32 %v235_v13  ;;  %v392_v54 = vshrl.u32 %v1162_v41, %v383_v27 }
  0x74   :  { %1044 = vcosq.f32 %v144_v36  ;;  %v239_v49 = vor.u32 4788187, %v238_v30  ;;  %v1443_v53 = vshrl.u32 %v325_v40, 30  ;;  %v394_v62 = vshll.u32 %v1162_v41, %v382_v11 }
  0x75   :  { %1046 = vsinq.f32 %v144_v36  ;;  %v395_v55 = vshrl.u32 %v1163_v43, %v383_v27  ;;  %v397_v56 = vshll.u32 %v1163_v43, %v382_v11  ;;  %vm152_vm9 = vcmp.eq.s32.totalorder %v1426_v47, 0 }
  0x76   :  { %vm155_vm10 = vcmp.eq.s32.totalorder %v1426_v47, 2  ;;  %v240_v57 = vand.u32 2147483647, %v239_v49  ;;  %v327_v61 = vshll.u32 %v1443_v53, 30  ;;  %v398_v3 = vshrl.u32 %v1164_v51, %v383_v27 }
  0x77   :  { %vm151_vm11 = vcmp.lt.s32.totalorder %v1426_v47, 2  ;;  %v253_v23 = vadd.s32 3, %v249_v32  ;;  %v384_v38 = vshrl.u32 %v1159_v35, %v383_v27  ;;  %v387_v4 = vor.u32 %v386_v42, %v385_v58 }
  0x78   :  { %v396_v9 = vor.u32 %v395_v55, %v394_v62  ;;  %v243_v8 = vmul.f32 %v242_v52, %v240_v57  ;;  %v1455_v16 = vsub.s32 %v324_v59, %v327_v61  ;;  %v390_v11 = vor.u32 %v389_v44, %v388_v34 }
  0x79   :  { %v399_v17 = vor.u32 %v398_v3, %v397_v56  ;;  %v393_v18 = vor.u32 %v392_v54, %v391_v46  ;;  %vm400_vm12 = vcmp.lt.s32.totalorder %v1433_v25, 1  ;;  %vm403_vm13 = vcmp.lt.s32.totalorder %v1433_v25, 4 }
  0x7a   :  { %v1459_v19 = vshll.u32 %v376_v15, 8  ;;  %v244_v20 = vxor.u32 2147483648, %v243_v8  ;;  %v330_v21 = vsub.s32 0, %v1455_v16  ;;  %vm401_vm14 = vcmp.lt.s32.totalorder %v1433_v25, 2 }
  0x7b   :  { %vm402_vm15 = vcmp.lt.s32.totalorder %v1433_v25, 3  ;;  %vm44_vm0 = vcmp.le.f32.partialorder %v1211_v0, 0.0  ;;  %vm148_vm1 = vweird.f32 %v1220_v5  ;;  %v405_v24 = vsel %vm403_vm13, %v393_v18, 2102212464 }
  0x7c   :  { %v409_v6 = vsel %vm403_vm13, %v396_v9, 920167782  ;;  %v413_v26 = vsel %vm403_vm13, %v399_v17, 1326507024  ;;  %v245_v12 = vsel %vm162_vm4, %v244_v20, %v243_v8  ;;  %v966_v15 = vmin.u32 %v330_v21, %v1455_v16 }
  0x7d   :  { %v404_v27 = vsel %vm400_vm12, %v384_v38, %v387_v4  ;;  %v408_v28 = vsel %vm400_vm12, %v387_v4, %v390_v11  ;;  %v248_v32 = vsel %vm1407_vm5, %v1222_v7, %v245_v12  ;;  %v410_v59 = vsel %vm402_vm15, %v393_v18, %v409_v6 }
  0x7e   :  { %v1045_v29 = vpop.eup %1044  ;;  %v412_v31 = vsel %vm400_vm12, %v390_v11, %v393_v18  ;;  %v414_v58 = vsel %vm402_vm15, %v396_v9, %v413_v26  ;;  %1048 = vcosq.f32 %v248_v32  ;;  %v332_v13 = vclz %v966_v15 }
  0x7f   :  { %v1047_v34 = vpop.eup %1046  ;;  %v156_v36 = vxor.u32 2147483648, %v1045_v29  ;;  %v406_v30 = vsel %vm402_vm15, %v390_v11, %v405_v24  ;;  %1050 = vsinq.f32 %v248_v32  ;;  %v254_v63 = vand.u32 3, %v253_v23  ;;  %v1537_v32 = vld [vmem:[#allocation5 + $0x10] sm:$0xff] }
  0x80   :  { %v153_v40 = vxor.u32 2147483648, %v1047_v34  ;;  %v320_v42 = vadd.s32 %v1401_v60, %v1393_v50  ;;  %v967_v46 = vadd.s32 4294967294, %v332_v13  ;;  %v411_v49 = vsel %vm401_vm14, %v408_v28, %v410_v59 }
  0x81   :  { %v157_v44 = vsel %vm155_vm10, %v156_v36, %v1047_v34  ;;  %v415_v52 = vsel %vm401_vm14, %v412_v31, %v414_v58  ;;  %v407_v62 = vsel %vm401_vm14, %v404_v27, %v406_v30  ;;  %v350_v25 = vsub.s32 4, %v1443_v53 }
  0x82   :  { %v154_v54 = vsel %vm152_vm9, %v1045_v29, %v153_v40  ;;  %v1497_v55 = vmul.u32.u64.low %v1459_v19, %v415_v52  ;;  %v1498_v56 = vmul.u32.u64.high %v1459_v19, %v415_v52, %v1497_v55  ;;  %vm968_vm2 = vcmp.lt.s32.totalorder %v967_v46, 0 }
  0x83   :  { %v158_v50 = vsel %vm151_vm11, %v154_v54, %v157_v44  ;;  %v1503_v60 = vmul.u32.u64.low %v1459_v19, %v411_v49  ;;  %v1504_v57 = vmul.u32.u64.high %v1459_v19, %v411_v49, %v1503_v60  ;;  %v335_v3 = vsel %vm968_vm2, 0, %v967_v46 }
  0x84   :  { %v159_v61 = vsel %vm148_vm1, nan, %v158_v50  ;;  %v1511_v23 = vmul.f32 1.5707964, %v1353_v22  ;;  %v336_v38 = vsub.s32 32, %v335_v3  ;;  %v337_v4 = vshll.u32 %v1455_v16, %v335_v3 }
  0x85   :  { %v340_v47 = vsub.s32 4294967266, %v335_v3  ;;  %v1514_v9 = vmul.f32 %v159_v61, %v159_v61  ;;  %vm252_vm3 = vweird.f32 %v1222_v7  ;;  %vm266_vm4 = vcmp.lt.s32.totalorder %v1226_v10, 0 }
  0x86   :  { %v423_v8 = vmul.u32 %v1459_v19, %v407_v62  ;;  %vm425_vm5 = vc.u32 %v1498_v56, %v1503_v60  ;;  %v338_v5 = vshrl.u32 %v320_v42, %v336_v38  ;;  %v426_v22 = vadd.s32 1, %v1504_v57 }
  0x87   :  { %v341_v11 = vadd.s32 127, %v340_v47  ;;  %v476_v16 = vsel %vm44_vm0, %v1514_v9, 0.0  ;;  %vm259_vm6 = vcmp.eq.s32.totalorder %v254_v63, 2  ;;  %vm1527_vm7 = vcmp.le.f32.partialorder %v264_v33, 0.7853982 }
  0x88   :  { %v351_v18 = vsel %vm266_vm4, %v350_v25, %v1443_v53  ;;  %v505_v19 = vand.u32 2139095040, %v1511_v23  ;;  %v1049_v20 = vpop.eup %1048  ;;  %v339_v21 = vor.u32 %v338_v5, %v337_v4  ;;  %v427_v6 = vsel %vm425_vm5, %v426_v22, %v1504_v57 }
  0x89   :  { %v342_v24 = vshll.u32 %v341_v11, 23  ;;  %v502_v0 = vand.u32 2147483647, %v1511_v23  ;;  %v1051_v26 = vpop.eup %1050  ;;  %vm256_vm8 = vcmp.eq.s32.totalorder %v254_v63, 0  ;;  %v260_v12 = vxor.u32 2147483648, %v1049_v20 }
  0x8a   :  { %v428_v33 = vadd.s32 %v427_v6, %v423_v8  ;;  %v506_v15 = vshrl.u32 %v505_v19, 23  ;;  %vm255_vm9 = vcmp.lt.s32.totalorder %v254_v63, 2  ;;  %v257_v27 = vxor.u32 2147483648, %v1051_v26 }
  0x8b   :  { %v343_v28 = vor.u32 4788187, %v342_v24  ;;  %v346_v29 = vcvt.s32.f32 %v339_v21  ;;  %v261_v53 = vsel %vm259_vm6, %v260_v12, %v1051_v26  ;;  %v353_v59 = vsel %vm1527_vm7, 0, %v351_v18 }
  0x8c   :  { %v429_v31 = vadd.s32 536870912, %v428_v33  ;;  %v973_v58 = vadd.s32 4294967169, %v506_v15  ;;  %vm45_vm10 = vcmp.le.f32.partialorder %v1213_v1, 0.0  ;;  %v258_v34 = vsel %vm256_vm8, %v1049_v20, %v257_v27 }
  0x8d   :  { %v344_v36 = vand.u32 2147483647, %v343_v28  ;;  %v509_v13 = vand.u32 8388607, %v502_v0  ;;  %v262_v30 = vsel %vm255_vm9, %v258_v34, %v261_v53  ;;  %1052 = vtanh.f32 %v1537_v32 }
  0x8e   :  { %v430_v40 = vshrl.u32 %v429_v31, 30  ;;  %v512_v42 = vadd.s32 1, %v973_v58  ;;  %v263_v63 = vsel %vm252_vm3, nan, %v262_v30  ;;  %v357_v46 = vadd.s32 3, %v353_v59 }
  0x8f   :  { %v347_v44 = vmul.f32 %v346_v29, %v344_v36  ;;  %v1549_v49 = vmul.f32 1.5707964, %v1359_v14  ;;  %vm370_vm11 = vcmp.lt.s32.totalorder %v1310_v45, 0  ;;  %v1552_v54 = vmul.f32 %v263_v63, %v263_v63 }
  0x90   :  { %v431_v52 = vshll.u32 %v430_v40, 30  ;;  %vm513_vm12 = vcmp.gt.s32.totalorder %v512_v42, 0  ;;  %v454_v55 = vsub.s32 4, %v430_v40  ;;  %v510_v50 = vor.u32 8388608, %v509_v13 }
  0x91   :  { %v348_v62 = vxor.u32 2147483648, %v347_v44  ;;  %v514_v57 = vsel %vm513_vm12, %v512_v42, 0  ;;  %vm1556_vm13 = vcmp.le.f32.partialorder %v368_v48, 0.7853982  ;;  %v477_v14 = vsel %vm45_vm10, %v1552_v54, 0.0 }
  0x92   :  { %v1560_v61 = vsub.s32 %v428_v33, %v431_v52  ;;  %v606_v3 = vand.u32 2147483647, %v1549_v49  ;;  %v1568_v38 = vand.u32 3, %v357_v46  ;;  %v1570_v4 = vadd.f32 %v477_v14, %v476_v16 }
  0x93   :  { %v349_v25 = vsel %vm266_vm4, %v348_v62, %v347_v44  ;;  %v609_v48 = vand.u32 2139095040, %v1549_v49  ;;  %v1577_v5 = vshrl.u32 %v514_v57, 5  ;;  %v516_v1 = vand.u32 31, %v514_v57 }
  0x94   :  { %v352_v47 = vsel %vm1527_vm7, %v1226_v10, %v349_v25  ;;  %v434_v8 = vsub.s32 0, %v1560_v61  ;;  %v424_v11 = vadd.s32 %v1503_v60, %v1498_v56  ;;  %v1583_v22 = vsel %vm370_vm11, %v454_v55, %v430_v40 }
  0x95   :  { %1054 = vcosq.f32 %v352_v47  ;;  %v1585_v16 = vshll.u32 %v510_v50, 8  ;;  %v517_v17 = vsub.s32 32, %v516_v1  ;;  %v1590_v19 = vand.u32 8388607, %v606_v3 }
  0x96   :  { %1056 = vsinq.f32 %v352_v47  ;;  %v970_v18 = vmin.u32 %v434_v8, %v1560_v61  ;;  %vm363_vm14 = vcmp.eq.s32.totalorder %v1568_v38, 2  ;;  %v519_v20 = vshll.u32 %v1159_v35, %v516_v1 }
  0x97   :  { %v522_v56 = vshll.u32 %v1160_v37, %v516_v1  ;;  %v525_v60 = vshll.u32 %v1161_v39, %v516_v1  ;;  %v610_v21 = vshrl.u32 %v609_v48, 23  ;;  %v1596_v24 = vpop.eup %1052  ;;  %vm360_vm15 = vcmp.eq.s32.totalorder %v1568_v38, 0 }
  0x98   :  { %v436_v6 = vclz %v970_v18  ;;  %v457_v26 = vsel %vm1556_vm13, 0, %v1583_v22  ;;  %v528_v12 = vshll.u32 %v1162_v41, %v516_v1  ;;  %vm534_vm0 = vcmp.lt.s32.totalorder %v1577_v5, 1 }
  0x99   :  { %vm359_vm1 = vcmp.lt.s32.totalorder %v1568_v38, 2  ;;  %v520_v33 = vshrl.u32 %v1160_v37, %v517_v17  ;;  %v523_v15 = vshrl.u32 %v1161_v39, %v517_v17  ;;  %v526_v27 = vshrl.u32 %v1162_v41, %v517_v17 }
  0x9a   :  { %vm535_vm2 = vcmp.lt.s32.totalorder %v1577_v5, 2  ;;  %vm356_vm3 = vweird.f32 %v1226_v10  ;;  %v971_v28 = vadd.s32 4294967294, %v436_v6  ;;  %v529_v29 = vshrl.u32 %v1163_v43, %v517_v17 }
  0x9b   :  { %v531_v53 = vshll.u32 %v1163_v43, %v516_v1  ;;  %v532_v59 = vshrl.u32 %v1164_v51, %v517_v17  ;;  %v518_v31 = vshrl.u32 %v1159_v35, %v517_v17  ;;  %v521_v58 = vor.u32 %v520_v33, %v519_v20  ;;  %v1638_v33 = vld [vmem:[#allocation5 + $0x18] sm:$0xff] }
  0x9c   :  { %v524_v34 = vor.u32 %v523_v15, %v522_v56  ;;  %v527_v36 = vor.u32 %v526_v27, %v525_v60  ;;  %vm972_vm4 = vcmp.lt.s32.totalorder %v971_v28, 0  ;;  %v530_v13 = vor.u32 %v529_v29, %v528_v12 }
  0x9d   :  { %v533_v30 = vor.u32 %v532_v59, %v531_v53  ;;  %vm537_vm5 = vcmp.lt.s32.totalorder %v1577_v5, 4  ;;  %vm46_vm6 = vcmp.le.f32.partialorder %v1215_v2, 0.0  ;;  %v439_v40 = vsel %vm972_vm4, 0, %v971_v28 }
  0x9e   :  { %vm536_vm7 = vcmp.lt.s32.totalorder %v1577_v5, 3  ;;  %v539_v42 = vsel %vm537_vm5, %v527_v36, 2102212464  ;;  %v977_v63 = vadd.s32 4294967169, %v610_v21  ;;  %v440_v44 = vsub.s32 32, %v439_v40 }
  0x9f   :  { %v441_v46 = vshll.u32 %v1560_v61, %v439_v40  ;;  %v444_v52 = vsub.s32 4294967266, %v439_v40  ;;  %v542_v62 = vsel %vm534_vm0, %v521_v58, %v524_v34  ;;  %v1055_v55 = vpop.eup %1054  ;;  %v538_v50 = vsel %vm534_vm0, %v518_v31, %v521_v58 }
  0xa0   :  { %v543_v57 = vsel %vm537_vm5, %v530_v13, 920167782  ;;  %v546_v14 = vsel %vm534_vm0, %v524_v34, %v527_v36  ;;  %v547_v25 = vsel %vm537_vm5, %v533_v30, 1326507024  ;;  %v1057_v48 = vpop.eup %1056  ;;  %v364_v47 = vxor.u32 2147483648, %v1055_v55 }
  0xa1   :  { %v442_v8 = vshrl.u32 %v424_v11, %v440_v44  ;;  %v445_v1 = vadd.s32 127, %v444_v52  ;;  %v544_v61 = vsel %vm536_vm7, %v527_v36, %v543_v57  ;;  %v361_v18 = vxor.u32 2147483648, %v1057_v48 }
  0xa2   :  { %v540_v17 = vsel %vm536_vm7, %v524_v34, %v539_v42  ;;  %v545_v20 = vsel %vm535_vm2, %v542_v62, %v544_v61  ;;  %v548_v56 = vsel %vm536_vm7, %v530_v13, %v547_v25  ;;  %v365_v60 = vsel %vm363_vm14, %v364_v47, %v1057_v48 }
  0xa3   :  { %v443_v21 = vor.u32 %v442_v8, %v441_v46  ;;  %v446_v6 = vshll.u32 %v445_v1, 23  ;;  %v549_v11 = vsel %vm535_vm2, %v546_v14, %v548_v56  ;;  %v362_v12 = vsel %vm360_vm15, %v1055_v55, %v361_v18 }
  0xa4   :  { %v1641_v15 = vmul.u32.u64.low %v1585_v16, %v549_v11  ;;  %v1642_v27 = vmul.u32.u64.high %v1585_v16, %v549_v11, %v1641_v15  ;;  %v616_v28 = vadd.s32 1, %v977_v63  ;;  %v366_v29 = vsel %vm359_vm1, %v362_v12, %v365_v60 }
  0xa5   :  { %v447_v53 = vor.u32 4788187, %v446_v6  ;;  %v450_v59 = vcvt.s32.f32 %v443_v21  ;;  %v541_v31 = vsel %vm535_vm2, %v538_v50, %v540_v17  ;;  %v367_v58 = vsel %vm356_vm3, nan, %v366_v29 }
  0xa6   :  { %v1651_v34 = vmul.u32.u64.low %v1585_v16, %v545_v20  ;;  %v1652_v36 = vmul.u32.u64.high %v1585_v16, %v545_v20, %v1651_v34  ;;  %vm617_vm8 = vcmp.gt.s32.totalorder %v616_v28, 0  ;;  %v1655_v30 = vmul.f32 %v367_v58, %v367_v58 }
  0xa7   :  { %v448_v13 = vand.u32 2147483647, %v447_v53  ;;  %1058 = vtanh.f32 %v1638_v33  ;;  %v618_v38 = vsel %vm617_vm8, %v616_v28, 0  ;;  %v461_v5 = vadd.s32 3, %v457_v26 }
  0xa8   :  { %v557_v10 = vmul.u32 %v1585_v16, %v541_v31  ;;  %v614_v40 = vor.u32 8388608, %v1590_v19  ;;  %v620_v42 = vand.u32 31, %v618_v38  ;;  %v478_v44 = vsel %vm46_vm6, %v1655_v30, 0.0 }
  0xa9   :  { %v451_v63 = vmul.f32 %v450_v59, %v448_v13  ;;  %vm559_vm9 = vc.u32 %v1642_v27, %v1651_v34  ;;  %v619_v46 = vshrl.u32 %v618_v38, 5  ;;  %v1670_v52 = vadd.f32 %v1570_v4, %v478_v44 }
  0xaa   :  { %v560_v22 = vadd.s32 1, %v1652_v36  ;;  %v621_v26 = vsub.s32 32, %v620_v42  ;;  %v623_v16 = vshll.u32 %v1159_v35, %v620_v42  ;;  %v626_v19 = vshll.u32 %v1160_v37, %v620_v42 }
  0xab   :  { %v452_v62 = vxor.u32 2147483648, %v451_v63  ;;  %v629_v55 = vshll.u32 %v1161_v39, %v620_v42  ;;  %v632_v2 = vshll.u32 %v1162_v41, %v620_v42  ;;  %v635_v17 = vshll.u32 %v1163_v43, %v620_v42 }
  0xac   :  { %v561_v50 = vsel %vm559_vm9, %v560_v22, %v1652_v36  ;;  %v622_v57 = vshrl.u32 %v1159_v35, %v621_v26  ;;  %v624_v14 = vshrl.u32 %v1160_v37, %v621_v26  ;;  %v627_v4 = vshrl.u32 %v1161_v39, %v621_v26 }
  0xad   :  { %v453_v25 = vsel %vm370_vm11, %v452_v62, %v451_v63  ;;  %v562_v48 = vadd.s32 %v561_v50, %v557_v10  ;;  %v630_v47 = vshrl.u32 %v1162_v41, %v621_v26  ;;  %v633_v8 = vshrl.u32 %v1163_v43, %v621_v26 }
  0xae   :  { %v456_v1 = vsel %vm1556_vm13, %v1310_v45, %v453_v25  ;;  %v625_v61 = vor.u32 %v624_v14, %v623_v16  ;;  %v628_v18 = vor.u32 %v627_v4, %v626_v19  ;;  %v636_v21 = vshrl.u32 %v1164_v51, %v621_v26  ;;  %v1080_v26 = vld [vmem:[#allocation2 + $0x18] sm:$0xff] }
  0xaf   :  { %1060 = vcosq.f32 %v456_v1  ;;  %v563_v20 = vadd.s32 536870912, %v562_v48  ;;  %v631_v56 = vor.u32 %v630_v47, %v629_v55  ;;  %v634_v60 = vor.u32 %v633_v8, %v632_v2 }
  0xb0   :  { %1062 = vsinq.f32 %v456_v1  ;;  %vm638_vm10 = vcmp.lt.s32.totalorder %v619_v46, 1  ;;  %v654_v6 = vshll.u32 %v614_v40, 8  ;;  %vm639_vm11 = vcmp.lt.s32.totalorder %v619_v46, 2 }
  0xb1   :  { %v1059_v11 = vpop.eup %1058  ;;  %v564_v12 = vshrl.u32 %v563_v20, 30  ;;  %vm640_vm12 = vcmp.lt.s32.totalorder %v619_v46, 3  ;;  %vm641_vm14 = vcmp.lt.s32.totalorder %v619_v46, 4  ;;  %v637_v7 = vor.u32 %v636_v21, %v635_v17 }
  0xb2   :  { %v643_v15 = vsel %vm641_vm14, %v631_v56, 2102212464  ;;  %v646_v28 = vsel %vm638_vm10, %v625_v61, %v628_v18  ;;  %v647_v29 = vsel %vm641_vm14, %v634_v60, 920167782  ;;  %v1692_v53 = vmul.f32 1.5707964, %v1596_v24 }
  0xb3   :  { %v565_v59 = vshll.u32 %v564_v12, 30  ;;  %v642_v31 = vsel %vm638_vm10, %v622_v57, %v625_v61  ;;  %v648_v58 = vsel %vm640_vm12, %v631_v56, %v647_v29  ;;  %v644_v36 = vsel %vm640_vm12, %v628_v18, %v643_v15 }
  0xb4   :  { %v649_v13 = vsel %vm639_vm11, %v646_v28, %v648_v58  ;;  %v650_v38 = vsel %vm638_vm10, %v628_v18, %v631_v56  ;;  %v651_v10 = vsel %vm641_vm14, %v637_v7, 1326507024  ;;  %v462_v40 = vand.u32 3, %v461_v5 }
  0xb5   :  { %v1699_v42 = vsub.s32 %v562_v48, %v565_v59  ;;  %v652_v63 = vsel %vm640_vm12, %v634_v60, %v651_v10  ;;  %vm460_vm13 = vweird.f32 %v1310_v45  ;;  %vm47_vm15 = vcmp.le.f32.partialorder %v1080_v26, 0.0 }
  0xb6   :  { %v653_v24 = vsel %vm639_vm11, %v650_v38, %v652_v63  ;;  %v1704_v44 = vmul.u32.u64.low %v654_v6, %v649_v13  ;;  %v1705_v22 = vmul.u32.u64.high %v654_v6, %v649_v13, %v1704_v44  ;;  %v645_v62 = vsel %vm639_vm11, %v642_v31, %v644_v36 }
  0xb7   :  { %v568_v16 = vsub.s32 0, %v1699_v42  ;;  %v1710_v19 = vmul.u32.u64.low %v654_v6, %v653_v24  ;;  %v1711_v5 = vmul.u32.u64.high %v654_v6, %v653_v24, %v1710_v19  ;;  %v1713_v55 = vmul.f32 1.5707964, %v1059_v11 }
  0xb8   :  { %vm504_vm0 = vcmp.lt.s32.totalorder %v1511_v23, 0  ;;  %v588_v2 = vsub.s32 4, %v564_v12  ;;  %v713_v50 = vand.u32 2139095040, %v1692_v53  ;;  %vm464_vm1 = vcmp.eq.s32.totalorder %v462_v40, 0 }
  0xb9   :  { %v1061_v57 = vpop.eup %1060  ;;  %vm467_vm2 = vcmp.eq.s32.totalorder %v462_v40, 2  ;;  %v480_v14 = vadd.f32 %v1552_v54, %v1514_v9  ;;  %v974_v4 = vmin.u32 %v568_v16, %v1699_v42  ;;  %v661_v48 = vmul.u32 %v654_v6, %v645_v62 }
  0xba   :  { %v1063_v46 = vpop.eup %1062  ;;  %v468_v25 = vxor.u32 2147483648, %v1061_v57  ;;  %v664_v47 = vadd.s32 1, %v1705_v22  ;;  %v714_v8 = vshrl.u32 %v713_v50, 23  ;;  %vm463_vm3 = vcmp.lt.s32.totalorder %v462_v40, 2 }
  0xbb   :  { %v465_v1 = vxor.u32 2147483648, %v1063_v46  ;;  %v570_v61 = vclz %v974_v4  ;;  %v710_v18 = vand.u32 2147483647, %v1692_v53  ;;  %vm1724_vm4 = vcmp.le.f32.partialorder %v502_v0, 0.7853982 }
  0xbc   :  { %v469_v17 = vsel %vm467_vm2, %v468_v25, %v1063_v46  ;;  %v589_v9 = vsel %vm504_vm0, %v588_v2, %v564_v12  ;;  %vm663_vm5 = vc.u32 %v1711_v5, %v1704_v44  ;;  %v981_v21 = vadd.s32 4294967169, %v714_v8 }
  0xbd   :  { %v466_v54 = vsel %vm464_vm1, %v1061_v57, %v465_v1  ;;  %v975_v56 = vadd.s32 4294967294, %v570_v61  ;;  %v665_v60 = vsel %vm663_vm5, %v664_v47, %v1705_v22  ;;  %v481_v11 = vadd.f32 %v480_v14, %v1655_v30 }
  0xbe   :  { %v470_v6 = vsel %vm463_vm3, %v466_v54, %v469_v17  ;;  %v558_v0 = vadd.s32 %v1651_v34, %v1642_v27  ;;  %v666_v7 = vadd.s32 %v665_v60, %v661_v48  ;;  %v717_v12 = vand.u32 8388607, %v710_v18 }
  0xbf   :  { %v471_v15 = vsel %vm460_vm13, nan, %v470_v6  ;;  %vm976_vm6 = vcmp.lt.s32.totalorder %v975_v56, 0  ;;  %v720_v28 = vadd.s32 1, %v981_v21  ;;  %v591_v31 = vsel %vm1724_vm4, 0, %v589_v9 }
  0xc0   :  { %v475_v29 = vmul.f32 %v471_v15, %v471_v15  ;;  %v573_v59 = vsel %vm976_vm6, 0, %v975_v56  ;;  %v667_v58 = vadd.s32 536870912, %v666_v7  ;;  %v718_v24 = vor.u32 8388608, %v717_v12 }
  0xc1   :  { %v574_v36 = vsub.s32 32, %v573_v59  ;;  %v575_v30 = vshll.u32 %v1699_v42, %v573_v59  ;;  %v578_v13 = vsub.s32 4294967266, %v573_v59  ;;  %vm721_vm7 = vcmp.gt.s32.totalorder %v720_v28, 0 }
  0xc2   :  { %v479_v27 = vsel %vm47_vm15, %v475_v29, 0.0  ;;  %v482_v45 = vadd.f32 %v481_v11, %v475_v29  ;;  %v668_v34 = vshrl.u32 %v667_v58, 30  ;;  %v722_v38 = vsel %vm721_vm7, %v720_v28, 0 }
  0xc3   :  { %v485_v10 = vadd.f32 %v1670_v52, %v479_v27  ;;  %v576_v40 = vshrl.u32 %v558_v0, %v574_v36  ;;  %v579_v63 = vadd.s32 127, %v578_v13  ;;  %vm608_vm8 = vcmp.lt.s32.totalorder %v1549_v49, 0 }
  0xc4   :  { %v669_v22 = vshll.u32 %v668_v34, 30  ;;  %v724_v16 = vand.u32 31, %v722_v38  ;;  %932 = vst [vmem:[#allocation7] sm:$0xff] %v482_v45  ;;  %v1747_v42 = vadd.s32 3, %v591_v31  ;;  %v662_v26 = vadd.s32 %v1704_v44, %v1711_v5 }
  0xc5   :  { %v577_v62 = vor.u32 %v576_v40, %v575_v30  ;;  %v580_v19 = vshll.u32 %v579_v63, 23  ;;  %934 = vst [vmem:[#allocation7 + $0x8] sm:$0xff] %v485_v10  ;;  %vm1753_vm9 = vcmp.le.f32.partialorder %v606_v3, 0.7853982  ;;  %v723_v50 = vshrl.u32 %v722_v38, 5 }
  0xc6   :  { %v1757_v2 = vsub.s32 %v666_v7, %v669_v22  ;;  %v725_v57 = vsub.s32 32, %v724_v16  ;;  %v817_v14 = vand.u32 2139095040, %v1713_v55  ;;  %v692_v25 = vsub.s32 4, %v668_v34 }
  0xc7   :  { %v581_v4 = vor.u32 4788187, %v580_v19  ;;  %v584_v46 = vcvt.s32.f32 %v577_v62  ;;  %v1760_v48 = vshll.u32 %v718_v24, 8  ;;  %v727_v5 = vshll.u32 %v1159_v35, %v724_v16 }
  0xc8   :  { %v672_v44 = vsub.s32 0, %v1757_v2  ;;  %v728_v3 = vshrl.u32 %v1160_v37, %v725_v57  ;;  %v730_v47 = vshll.u32 %v1160_v37, %v724_v16  ;;  %v731_v1 = vshrl.u32 %v1161_v39, %v725_v57 }
  0xc9   :  { %v582_v8 = vand.u32 2147483647, %v581_v4  ;;  %v733_v61 = vshll.u32 %v1161_v39, %v724_v16  ;;  %v734_v17 = vshrl.u32 %v1162_v41, %v725_v57  ;;  %v736_v54 = vshll.u32 %v1162_v41, %v724_v16 }
  0xca   :  { %v978_v9 = vmin.u32 %v672_v44, %v1757_v2  ;;  %vm742_vm10 = vcmp.lt.s32.totalorder %v723_v50, 1  ;;  %v818_v56 = vshrl.u32 %v817_v14, 23  ;;  %v693_v21 = vsel %vm608_vm8, %v692_v25, %v668_v34 }
  0xcb   :  { %v585_v60 = vmul.f32 %v584_v46, %v582_v8  ;;  %v726_v6 = vshrl.u32 %v1159_v35, %v725_v57  ;;  %v737_v11 = vshrl.u32 %v1163_v43, %v725_v57  ;;  %v729_v7 = vor.u32 %v728_v3, %v727_v5 }
  0xcc   :  { %v674_v0 = vclz %v978_v9  ;;  %v732_v15 = vor.u32 %v731_v1, %v730_v47  ;;  %v735_v12 = vor.u32 %v734_v17, %v733_v61  ;;  %v739_v59 = vshll.u32 %v1163_v43, %v724_v16 }
  0xcd   :  { %v586_v28 = vxor.u32 2147483648, %v585_v60  ;;  %v738_v29 = vor.u32 %v737_v11, %v736_v54  ;;  %v740_v31 = vshrl.u32 %v1164_v51, %v725_v57  ;;  %vm743_vm11 = vcmp.lt.s32.totalorder %v723_v50, 2 }
  0xce   :  { %v979_v58 = vadd.s32 4294967294, %v674_v0  ;;  %vm744_vm12 = vcmp.lt.s32.totalorder %v723_v50, 3  ;;  %vm745_vm14 = vcmp.lt.s32.totalorder %v723_v50, 4  ;;  %v695_v30 = vsel %vm1753_vm9, 0, %v693_v21 }
  0xcf   :  { %v587_v36 = vsel %vm504_vm0, %v586_v28, %v585_v60  ;;  %v741_v13 = vor.u32 %v740_v31, %v739_v59  ;;  %v747_v27 = vsel %vm745_vm14, %v735_v12, 2102212464  ;;  %v750_v34 = vsel %vm742_vm10, %v729_v7, %v732_v15 }
  0xd0   :  { %v590_v45 = vsel %vm1724_vm4, %v1511_v23, %v587_v36  ;;  %vm980_vm13 = vcmp.lt.s32.totalorder %v979_v58, 0  ;;  %v751_v38 = vsel %vm745_vm14, %v738_v29, 920167782  ;;  %v746_v40 = vsel %vm742_vm10, %v726_v6, %v729_v7 }
  0xd1   :  { %v677_v10 = vsel %vm980_vm13, 0, %v979_v58  ;;  %v748_v63 = vsel %vm744_vm12, %v732_v15, %v747_v27  ;;  %v752_v24 = vsel %vm744_vm12, %v735_v12, %v751_v38  ;;  %1064 = vcosq.f32 %v590_v45 }
  0xd2   :  { %v678_v22 = vsub.s32 32, %v677_v10  ;;  %v679_v16 = vshll.u32 %v1757_v2, %v677_v10  ;;  %v682_v62 = vsub.s32 4294967266, %v677_v10  ;;  %1066 = vsinq.f32 %v590_v45 }
  0xd3   :  { %v753_v20 = vsel %vm743_vm11, %v750_v34, %v752_v24  ;;  %v754_v19 = vsel %vm742_vm10, %v732_v15, %v735_v12  ;;  %v755_v57 = vsel %vm745_vm14, %v741_v13, 1326507024  ;;  %v985_v25 = vadd.s32 4294967169, %v818_v56 }
  0xd4   :  { %v680_v14 = vshrl.u32 %v662_v26, %v678_v22  ;;  %v683_v4 = vadd.s32 127, %v682_v62  ;;  %v756_v46 = vsel %vm744_vm12, %v738_v29, %v755_v57  ;;  %v749_v44 = vsel %vm743_vm11, %v746_v40, %v748_v63 }
  0xd5   :  { %v757_v5 = vsel %vm743_vm11, %v754_v19, %v756_v46  ;;  %v1798_v3 = vmul.u32.u64.low %v1760_v48, %v753_v20  ;;  %v1799_v2 = vmul.u32.u64.high %v1760_v48, %v753_v20, %v1798_v3  ;;  %v814_v26 = vand.u32 2147483647, %v1713_v55 }
  0xd6   :  { %v681_v47 = vor.u32 %v680_v14, %v679_v16  ;;  %v684_v8 = vshll.u32 %v683_v4, 23  ;;  %v1803_v1 = vmul.u32.u64.low %v1760_v48, %v757_v5  ;;  %v1804_v61 = vmul.u32.u64.high %v1760_v48, %v757_v5, %v1803_v1 }
  0xd7   :  { %v824_v17 = vadd.s32 1, %v985_v25  ;;  %v765_v56 = vmul.u32 %v1760_v48, %v749_v44  ;;  %v1809_v50 = vand.u32 3, %v1747_v42  ;;  %v699_v60 = vadd.s32 3, %v695_v30 }
  0xd8   :  { %v685_v9 = vor.u32 4788187, %v684_v8  ;;  %v688_v54 = vcvt.s32.f32 %v681_v47  ;;  %v768_v21 = vadd.s32 1, %v1799_v2  ;;  %vm767_vm0 = vc.u32 %v1804_v61, %v1798_v3 }
  0xd9   :  { %vm825_vm15 = vcmp.gt.s32.totalorder %v824_v17, 0  ;;  %v821_v7 = vand.u32 8388607, %v814_v26  ;;  %vm598_vm1 = vcmp.eq.s32.totalorder %v1809_v50, 0  ;;  %vm601_vm2 = vcmp.eq.s32.totalorder %v1809_v50, 2 }
  0xda   :  { %v686_v6 = vand.u32 2147483647, %v685_v9  ;;  %v826_v11 = vsel %vm825_vm15, %v824_v17, 0  ;;  %v769_v0 = vsel %vm767_vm0, %v768_v21, %v1799_v2  ;;  %v1819_v29 = vand.u32 3, %v699_v60 }
  0xdb   :  { %v828_v15 = vand.u32 31, %v826_v11  ;;  %v1065_v12 = vpop.eup %1064  ;;  %v770_v28 = vadd.s32 %v769_v0, %v765_v56  ;;  %vm597_vm3 = vcmp.lt.s32.totalorder %v1809_v50, 2  ;;  %v822_v13 = vor.u32 8388608, %v821_v7 }
  0xdc   :  { %v689_v48 = vmul.f32 %v688_v54, %v686_v6  ;;  %v1067_v42 = vpop.eup %1066  ;;  %v827_v27 = vshrl.u32 %v826_v11, 5  ;;  %vm594_vm4 = vweird.f32 %v1511_v23  ;;  %v602_v22 = vxor.u32 2147483648, %v1065_v12  ;;  %v1081_v6 = vld [vmem:[#allocation5] sm:$0xff] }
  0xdd   :  { %v829_v59 = vsub.s32 32, %v828_v15  ;;  %v771_v58 = vadd.s32 536870912, %v770_v28  ;;  %v831_v36 = vshll.u32 %v1159_v35, %v828_v15  ;;  %v834_v30 = vshll.u32 %v1160_v37, %v828_v15 }
  0xde   :  { %v690_v31 = vxor.u32 2147483648, %v689_v48  ;;  %v837_v40 = vshll.u32 %v1161_v39, %v828_v15  ;;  %v599_v24 = vxor.u32 2147483648, %v1067_v42  ;;  %v843_v14 = vshll.u32 %v1163_v43, %v828_v15 }
  0xdf   :  { %v832_v45 = vshrl.u32 %v1160_v37, %v829_v59  ;;  %v835_v34 = vshrl.u32 %v1161_v39, %v829_v59  ;;  %v1828_v10 = vshrl.u32 %v771_v58, 30  ;;  %v838_v63 = vshrl.u32 %v1162_v41, %v829_v59 }
  0xe0   :  { %v691_v38 = vsel %vm608_vm8, %v690_v31, %v689_v48  ;;  %v830_v37 = vshrl.u32 %v1159_v35, %v829_v59  ;;  %v840_v39 = vshll.u32 %v1162_v41, %v828_v15  ;;  %v841_v57 = vshrl.u32 %v1163_v43, %v829_v59 }
  0xe1   :  { %v694_v16 = vsel %vm1753_vm9, %v1549_v49, %v691_v38  ;;  %v773_v62 = vshll.u32 %v1828_v10, 30  ;;  %v833_v20 = vor.u32 %v832_v45, %v831_v36  ;;  %v836_v19 = vor.u32 %v835_v34, %v834_v30 }
  0xe2   :  { %1068 = vcosq.f32 %v694_v16  ;;  %v839_v46 = vor.u32 %v838_v63, %v837_v40  ;;  %v844_v52 = vshrl.u32 %v1164_v51, %v829_v59  ;;  %vm846_vm5 = vcmp.lt.s32.totalorder %v827_v27, 1 }
  0xe3   :  { %1070 = vsinq.f32 %v694_v16  ;;  %v1841_v4 = vsub.s32 %v770_v28, %v773_v62  ;;  %v600_v35 = vsel %vm598_vm1, %v1065_v12, %v599_v24  ;;  %v603_v25 = vsel %vm601_vm2, %v602_v22, %v1067_v42  ;;  %v1082_v16 = vld [vmem:[#allocation5 + $0x8] sm:$0xff] }
  0xe4   :  { %v842_v44 = vor.u32 %v841_v57, %v840_v39  ;;  %vm848_vm6 = vcmp.lt.s32.totalorder %v827_v27, 3  ;;  %v845_v5 = vor.u32 %v844_v52, %v843_v14  ;;  %vm847_vm7 = vcmp.lt.s32.totalorder %v827_v27, 2 }
  0xe5   :  { %v776_v41 = vsub.s32 0, %v1841_v4  ;;  %vm849_vm8 = vcmp.lt.s32.totalorder %v827_v27, 4  ;;  %v854_v2 = vsel %vm846_vm5, %v833_v20, %v836_v19  ;;  %v862_v8 = vshll.u32 %v822_v13, 8 }
  0xe6   :  { %v851_v43 = vsel %vm849_vm8, %v839_v46, 2102212464  ;;  %v855_v47 = vsel %vm849_vm8, %v842_v44, 920167782  ;;  %v850_v1 = vsel %vm846_vm5, %v830_v37, %v833_v20  ;;  %v604_v54 = vsel %vm597_vm3, %v600_v35, %v603_v25 }
  0xe7   :  { %v982_v51 = vmin.u32 %v776_v41, %v1841_v4  ;;  %v852_v17 = vsel %vm848_vm6, %v836_v19, %v851_v43  ;;  %v856_v9 = vsel %vm848_vm6, %v839_v46, %v855_v47  ;;  %v858_v60 = vsel %vm846_vm5, %v836_v19, %v839_v46 }
  0xe8   :  { %v857_v56 = vsel %vm847_vm7, %v854_v2, %v856_v9  ;;  %v859_v21 = vsel %vm849_vm8, %v845_v5, 1326507024  ;;  %vm490_vm9 = vcmp.le.f32.partialorder %v1081_v6, 0.0  ;;  %vm698_vm10 = vweird.f32 %v1549_v49 }
  0xe9   :  { %vm701_vm11 = vcmp.lt.s32.totalorder %v1819_v29, 2  ;;  %v778_v11 = vclz %v982_v51  ;;  %v853_v0 = vsel %vm847_vm7, %v850_v1, %v852_v17  ;;  %v860_v7 = vsel %vm848_vm6, %v842_v44, %v859_v21 }
  0xea   :  { %v1862_v15 = vmul.u32.u64.low %v862_v8, %v857_v56  ;;  %v1863_v12 = vmul.u32.u64.high %v862_v8, %v857_v56, %v1862_v15  ;;  %v605_v48 = vsel %vm594_vm4, nan, %v604_v54  ;;  %vm705_vm12 = vcmp.eq.s32.totalorder %v1819_v29, 2 }
  0xeb   :  { %v983_v28 = vadd.s32 4294967294, %v778_v11  ;;  %v861_v42 = vsel %vm847_vm7, %v858_v60, %v860_v7  ;;  %vm702_vm14 = vcmp.eq.s32.totalorder %v1819_v29, 0  ;;  %v766_v13 = vadd.s32 %v1798_v3, %v1804_v61 }
  0xec   :  { %v1069_v50 = vpop.eup %1068  ;;  %v1870_v58 = vmul.u32.u64.low %v862_v8, %v861_v42  ;;  %v1871_v36 = vmul.u32.u64.high %v862_v8, %v861_v42, %v1870_v58  ;;  %v869_v45 = vmul.u32 %v862_v8, %v853_v0  ;;  %v872_v38 = vadd.s32 1, %v1863_v12 }
  0xed   :  { %v1071_v59 = vpop.eup %1070  ;;  %v706_v31 = vxor.u32 2147483648, %v1069_v50  ;;  %vm984_vm13 = vcmp.lt.s32.totalorder %v983_v28, 0  ;;  %v1876_v40 = vmul.f32 %v605_v48, %v605_v48  ;;  %vm491_vm15 = vcmp.le.f32.partialorder %v1082_v16, 0.0 }
  0xee   :  { %v703_v30 = vxor.u32 2147483648, %v1071_v59  ;;  %v781_v34 = vsel %vm984_vm13, 0, %v983_v28  ;;  %vm871_vm0 = vc.u32 %v1871_v36, %v1862_v15  ;;  %vm712_vm1 = vcmp.lt.s32.totalorder %v1692_v53, 0 }
  0xef   :  { %v707_v23 = vsel %vm705_vm12, %v706_v31, %v1071_v59  ;;  %v782_v63 = vsub.s32 32, %v781_v34  ;;  %v783_v24 = vshll.u32 %v1841_v4, %v781_v34  ;;  %v786_v22 = vsub.s32 4294967266, %v781_v34 }
  0xf0   :  { %v704_v27 = vsel %vm702_vm14, %v1069_v50, %v703_v30  ;;  %v873_v20 = vsel %vm871_vm0, %v872_v38, %v1863_v12  ;;  %v922_v57 = vsel %vm490_vm9, %v1876_v40, 0.0  ;;  %vm1895_vm2 = vcmp.le.f32.partialorder %v710_v18, 0.7853982 }
  0xf1   :  { %v708_v37 = vsel %vm701_vm11, %v704_v27, %v707_v23  ;;  %v784_v61 = vshrl.u32 %v766_v13, %v782_v63  ;;  %v787_v62 = vadd.s32 127, %v786_v22  ;;  %v874_v19 = vadd.s32 %v873_v20, %v869_v45 }
  0xf2   :  { %v709_v3 = vsel %vm698_vm10, nan, %v708_v37  ;;  %v796_v9 = vsub.s32 4, %v1828_v10  ;;  %v870_v60 = vadd.s32 %v1862_v15, %v1871_v36  ;;  %vm1909_vm4 = vcmp.le.f32.partialorder %v814_v26, 0.7853982 }
  0xf3   :  { %v1885_v39 = vmul.f32 %v709_v3, %v709_v3  ;;  %v785_v14 = vor.u32 %v784_v61, %v783_v24  ;;  %v788_v4 = vshll.u32 %v787_v62, 23  ;;  %v875_v46 = vadd.s32 536870912, %v874_v19 }
  0xf4   :  { %v797_v21 = vsel %vm712_vm1, %v796_v9, %v1828_v10  ;;  %vm816_vm5 = vcmp.lt.s32.totalorder %v1713_v55, 0  ;;  %vm802_vm9 = vweird.f32 %v1692_v53  ;;  %vm492_vm10 = vcmp.le.f32.partialorder %v1537_v32, 0.0 }
  0xf5   :  { %v923_v29 = vsel %vm491_vm15, %v1885_v39, 0.0  ;;  %v789_v52 = vor.u32 4788187, %v788_v4  ;;  %v792_v35 = vcvt.s32.f32 %v785_v14  ;;  %v876_v49 = vshrl.u32 %v875_v46, 30 }
  0xf6   :  { %v1890_v25 = vadd.f32 %v923_v29, %v922_v57  ;;  %v799_v7 = vsel %vm1895_vm2, 0, %v797_v21  ;;  %v926_v4 = vadd.f32 %v1885_v39, %v1876_v40  ;;  %vm906_vm13 = vweird.f32 %v1713_v55 }
  0xf7   :  { %v790_v44 = vand.u32 2147483647, %v789_v52  ;;  %v877_v41 = vshll.u32 %v876_v49, 30  ;;  %v803_v42 = vadd.s32 3, %v799_v7  ;;  %v900_v36 = vsub.s32 4, %v876_v49 }
  0xf8   :  { %vm493_vm15 = vcmp.le.f32.partialorder %v1638_v33, 0.0 }
  0xf9   :  { %v793_v5 = vmul.f32 %v792_v35, %v790_v44  ;;  %v878_v43 = vsub.s32 %v874_v19, %v877_v41  ;;  %v804_v10 = vand.u32 3, %v803_v42  ;;  %v901_v27 = vsel %vm816_vm5, %v900_v36, %v876_v49 }
  0xfa   :  { %v903_v22 = vsel %vm1909_vm4, 0, %v901_v27 }
  0xfb   :  { %v794_v2 = vxor.u32 2147483648, %v793_v5  ;;  %v880_v47 = vsub.s32 0, %v878_v43  ;;  %vm806_vm6 = vcmp.eq.s32.totalorder %v804_v10, 0  ;;  %vm809_vm7 = vcmp.eq.s32.totalorder %v804_v10, 2 }
  0xfc   :  { %vm805_vm8 = vcmp.lt.s32.totalorder %v804_v10, 2  ;;  %v907_v37 = vadd.s32 3, %v903_v22 }
  0xfd   :  { %v795_v51 = vsel %vm712_vm1, %v794_v2, %v793_v5  ;;  %v986_v1 = vmin.u32 %v880_v47, %v878_v43 }
  0xfe   :  { %v798_v54 = vsel %vm1895_vm2, %v1692_v53, %v795_v51  ;;  %v908_v62 = vand.u32 3, %v907_v37 }
  0xff   :  { %v882_v17 = vclz %v986_v1  ;;  %1072 = vcosq.f32 %v798_v54 }
 0x100   :  { %1074 = vsinq.f32 %v798_v54  ;;  %vm913_vm11 = vcmp.eq.s32.totalorder %v908_v62, 2  ;;  %vm910_vm12 = vcmp.eq.s32.totalorder %v908_v62, 0  ;;  %vm909_vm14 = vcmp.lt.s32.totalorder %v908_v62, 2 }
 0x101   :  { %v987_v56 = vadd.s32 4294967294, %v882_v17 }
 0x103   :  { %vm988_vm3 = vcmp.lt.s32.totalorder %v987_v56, 0 }
 0x104   :  { %v885_v18 = vsel %vm988_vm3, 0, %v987_v56 }
 0x105   :  { %v886_v6 = vsub.s32 32, %v885_v18  ;;  %v887_v11 = vshll.u32 %v878_v43, %v885_v18  ;;  %v890_v0 = vsub.s32 4294967266, %v885_v18 }
 0x107   :  { %v888_v12 = vshrl.u32 %v870_v60, %v886_v6  ;;  %v891_v50 = vadd.s32 127, %v890_v0 }
 0x109   :  { %v889_v48 = vor.u32 %v888_v12, %v887_v11  ;;  %v892_v28 = vshll.u32 %v891_v50, 23  ;;  %v1073_v58 = vpop.eup %1072 }
 0x10a   :  { %v1075_v30 = vpop.eup %1074  ;;  %v810_v34 = vxor.u32 2147483648, %v1073_v58 }
 0x10b   :  { %v893_v59 = vor.u32 4788187, %v892_v28  ;;  %v896_v31 = vcvt.s32.f32 %v889_v48  ;;  %v807_v23 = vxor.u32 2147483648, %v1075_v30 }
 0x10c   :  { %v811_v16 = vsel %vm809_vm7, %v810_v34, %v1075_v30 }
 0x10d   :  { %v894_v15 = vand.u32 2147483647, %v893_v59  ;;  %v808_v26 = vsel %vm806_vm6, %v1073_v58, %v807_v23 }
 0x10e   :  { %v812_v3 = vsel %vm805_vm8, %v808_v26, %v811_v16 }
 0x10f   :  { %v897_v13 = vmul.f32 %v896_v31, %v894_v15  ;;  %v813_v61 = vsel %vm802_vm9, nan, %v812_v3 }
 0x110   :  { %v920_v20 = vmul.f32 %v813_v61, %v813_v61 }
 0x111   :  { %v898_v38 = vxor.u32 2147483648, %v897_v13 }
 0x112   :  { %v924_v53 = vsel %vm492_vm10, %v920_v20, 0.0  ;;  %v927_v49 = vadd.f32 %v926_v4, %v920_v20 }
 0x113   :  { %v899_v63 = vsel %vm816_vm5, %v898_v38, %v897_v13  ;;  %v930_v32 = vadd.f32 %v1890_v25, %v924_v53 }
 0x114   :  { %v902_v24 = vsel %vm1909_vm4, %v1713_v55, %v899_v63 }
 0x115   :  { %1076 = vcosq.f32 %v902_v24 }
 0x116   :  { %1078 = vsinq.f32 %v902_v24 }
 0x11f   :  { %v1077_v19 = vpop.eup %1076 }
 0x120   :  { %v1079_v57 = vpop.eup %1078  ;;  %v914_v14 = vxor.u32 2147483648, %v1077_v19 }
 0x121   :  { %v911_v46 = vxor.u32 2147483648, %v1079_v57 }
 0x122   :  { %v915_v29 = vsel %vm913_vm11, %v914_v14, %v1079_v57 }
 0x123   :  { %v912_v52 = vsel %vm910_vm12, %v1077_v19, %v911_v46 }
 0x124   :  { %v916_v35 = vsel %vm909_vm14, %v912_v52, %v915_v29 }
 0x125   :  { %v917_v44 = vsel %vm906_vm13, nan, %v916_v35 }
 0x126   :  { %v921_v41 = vmul.f32 %v917_v44, %v917_v44 }
 0x128   :  { %v925_v5 = vsel %vm493_vm15, %v921_v41, 0.0  ;;  %v928_v43 = vadd.f32 %v927_v49, %v921_v41 }
 0x129   :  { %v931_v40 = vadd.f32 %v930_v32, %v925_v5 }
 0x12a   :  { %936 = vst [vmem:[#allocation7 + $0x10] sm:$0xff] %v928_v43 }
 0x12b   :  { %938 = vst [vmem:[#allocation7 + $0x18] sm:$0xff] %v931_v40 }
 0x12c   :  { %1138 = shalt.err (!%p1135_p6)
}
 0x12d   :  { %s1139_s10 = scalar_lea.hbm %s1943_s2, 512 }
 0x12e   :  { %p1140_p7 = scmp.ne.s32.totalorder %s1943_s2, %s1139_s10  ;;  %p1143_p8 = scmp.lt.u32.totalorder %s1139_s10, %s1943_s2 }
 0x130   :  { %p1145_p9 = pnand %p1143_p8, %p1140_p7 }
 0x132   :  { %1148 = shalt.err (!%p1145_p9)
}
 0x133   :  { %950 = dma.vmem_to_hbm [thread:$0]  %s945_s6, 512, %s1943_s2, [#allocation4], %s1156_s19, %s1156_s19, %s1157_s20  }
 0x134   :  { %1153 = dma.done.wait [#allocation4], 512  }
 0x135   :  { %1154 = vsyncadd [#allocation4], 4294966784 }
 0x136   :  { %954 = vsyncpa [#allocation3], 1 }
 0x137   :  { %955 = vsyncpa [#allocation6], 1 }
 0x138   :  { %956 = vsyncpa [#allocation4], 1 }

</bundles_post_ra>
